<compile_context>
chip_gen: v5e
topology: v5e:2x2
jax: 0.10.0
libtpu: 0.0.40
codegen_flags: <defaults>
</compile_context>

<pallas_src>
import functools

import jax
import jax.numpy as jnp
import numpy as np
from jax import lax
from jax.experimental import pallas as pl
from jax.experimental.pallas import tpu as pltpu


def _ctg_kernel(x_ref, w1_ref, b1_ref, w2_ref, b2_ref, out_ref, *, C):
    # x_ref : (M, S*T)    rows m = (b, c), cols = s*T + t
    # w1_ref: (S*T, 3*T)  mean + conv1 taps folded, pre-scaled by 1/S
    # b1_ref: (1, T)
    # w2_ref: (T, 3*Kp)   conv2 taps, each tap block zero-padded to Kp lanes
    # b2_ref: (1, Kp)     zero-padded bias
    # out_ref: (M, Kp)    lane-dense (Kp = round_up(K, 128)), unmasked store
    M = x_ref.shape[0]
    T = b1_ref.shape[1]
    Kp = b2_ref.shape[1]

    x2d = x_ref[...]

    # Per-batch boundary masks, hoisted and reused for both conv stages.
    row = lax.broadcasted_iota(jnp.int32, (M, 1), 0)
    c_idx = row % C
    keep_left = c_idx != 0          # keep contribution coming from channel c-1
    keep_right = c_idx != (C - 1)   # keep contribution coming from channel c+1

    def tap_combine(p, n, bias):
        # p: (M, 3n).  tap k=0 -> source channel c-1, k=1 -> c, k=2 -> c+1.
        p0 = p[:, 0:n]
        p1 = p[:, n:2 * n]
        p2 = p[:, 2 * n:3 * n]
        left = jnp.where(keep_left, pltpu.roll(p0, shift=1, axis=0), 0.0)
        right = jnp.where(keep_right, pltpu.roll(p2, shift=M - 1, axis=0), 0.0)
        return left + p1 + right + bias

    # conv1 (spatial mean folded into the weights): one MXU push,
    # contraction dim S*T, N = 3T.
    p = jnp.dot(x2d, w1_ref[...], preferred_element_type=jnp.float32)   # (M, 3T)
    y = jnp.maximum(tap_combine(p, T, b1_ref[...]), 0.0)                # (M, T)

    # conv2: one MXU push, contraction dim T, N = 3*Kp (lane-aligned taps).
    q = jnp.dot(y, w2_ref[...], preferred_element_type=jnp.float32)     # (M, 3*Kp)
    z = tap_combine(q, Kp, b2_ref[...])                                 # (M, Kp)

    out_ref[...] = z.astype(out_ref.dtype)


def _round_up(v, m):
    return ((v + m - 1) // m) * m


def _pick_bblk(B, C, S, T, itemsize=4,
               min_step_bytes=1 << 20, max_step_bytes=8 << 20):
    """Batches per grid step.  Default is bblk == B (single step): at small
    shapes the per-step pipeline overhead (~0.35 us) dwarfs the work.  Only
    split when a single step's input block is large, keeping rows = bblk*C
    8-aligned and the double-buffered block inside v7x's 32 MiB scoped VMEM.
    Invariant: block row boundaries always coincide with batch boundaries."""
    def step_bytes(d):
        return d * C * S * T * itemsize

    if step_bytes(B) <= max(2 * min_step_bytes, max_step_bytes):
        return B  # single step; full-extent block is always legal

    divs = [d for d in range(1, B + 1) if B % d == 0 and (d * C) % 8 == 0]
    if not divs:
        return B
    good = [d for d in divs if min_step_bytes <= step_bytes(d) <= max_step_bytes]
    if good:
        return min(good)
    under = [d for d in divs if step_bytes(d) <= max_step_bytes]
    return max(under) if under else min(divs)


def pack_ctg_params(w1, b1, w2, b2, S):
    """One-time repacking of ChannelTimeGate weights (hoisted off the per-call
    critical path).  w1: (T, T, 3), b1: (T,), w2: (K, T, 3), b2: (K,)."""
    T = w1.shape[0]
    K = w2.shape[0]
    Kp = _round_up(K, 128)

    # W1_big[s*T + i, k*T + o] = w1[o, i, k] / S  (mean folded into weights).
    w1_big = (jnp.tile(jnp.transpose(w1, (1, 2, 0)).reshape(T, 3 * T), (S, 1))
              / float(S)).astype(jnp.float32)
    b1r = b1.reshape(1, T).astype(jnp.float32)

    # W2_big[i, k*Kp + o] = w2[o, i, k] for o < K, 0 otherwise (lane-aligned
    # taps + lane-dense output slab).
    w2t = jnp.transpose(w2, (1, 2, 0))                       # (T, 3, K)
    w2t = jnp.pad(w2t, ((0, 0), (0, 0), (0, Kp - K)))        # (T, 3, Kp)
    w2_big = w2t.reshape(T, 3 * Kp).astype(jnp.float32)
    b2r = jnp.pad(b2, (0, Kp - K)).reshape(1, Kp).astype(jnp.float32)

    return (w1_big, b1r, w2_big, b2r, int(K))


def channel_time_gate(x, packed):
    """x: (B, C, S, T) f32; packed = pack_ctg_params(...).
    Returns (B, 1, C, 1, K), matching the PyTorch module."""
    B, C, S, T = x.shape
    w1_big, b1r, w2_big, b2r, K = packed
    Kp = b2r.shape[1]

    # x -> (B*C, S*T): contiguous reshape, lane-dense last dim.
    x2d = x.reshape(B * C, S * T)

    bblk = _pick_bblk(B, C, S, T)
    grid = (B // bblk,)
    rows = bblk * C

    out2d = pl.pallas_call(
        functools.partial(_ctg_kernel, C=C),
        out_shape=jax.ShapeDtypeStruct((B * C, Kp), x.dtype),
        grid=grid,
        in_specs=[
            pl.BlockSpec((rows, S * T), lambda b: (b, 0)),
            pl.BlockSpec((S * T, 3 * T), lambda b: (0, 0)),   # VMEM-resident
            pl.BlockSpec((1, T), lambda b: (0, 0)),
            pl.BlockSpec((T, 3 * Kp), lambda b: (0, 0)),
            pl.BlockSpec((1, Kp), lambda b: (0, 0)),
        ],
        out_specs=pl.BlockSpec((rows, Kp), lambda b: (b, 0)),
        compiler_params=pltpu.CompilerParams(dimension_semantics=("parallel",)),
    )(x2d, w1_big, b1r, w2_big, b2r)

    # Drop zero padding lanes, then
    # (B*C, K) -> (B, 1, C, 1, K)  == transpose(1,2) + unsqueeze(1) + unsqueeze(-2)
    return out2d[:, :K].reshape(B, 1, C, 1, K)


def _reference(x, w1, b1, w2, b2):
    """Pure-JAX reference following the PyTorch forward exactly."""
    h = jnp.transpose(jnp.mean(x, axis=2), (0, 2, 1))          # (B, T, C)
    dn = ('NCW', 'OIW', 'NCW')
    h = lax.conv_general_dilated(h, w1, window_strides=(1,), padding=[(1, 1)],
                                 dimension_numbers=dn, precision=lax.Precision.HIGHEST)
    h = jax.nn.relu(h + b1[None, :, None])
    h = lax.conv_general_dilated(h, w2, window_strides=(1,), padding=[(1, 1)],
                                 dimension_numbers=dn, precision=lax.Precision.HIGHEST)
    h = h + b2[None, :, None]                                  # (B, K, C)
    h = jnp.transpose(h, (0, 2, 1))                            # (B, C, K)
    return h[:, None, :, None, :]                              # (B, 1, C, 1, K)


if __name__ == "__main__":
    # time_len = T, kernel = K.
    B, C, S, T, K = 8, 16, 8, 8, 4

    key = jax.random.PRNGKey(0)
    kx, k1, kb1, k2, kb2 = jax.random.split(key, 5)

    x = jax.random.normal(kx, (B, C, S, T), dtype=jnp.float32)

    # kaiming_normal_(mode='fan_out', nonlinearity='relu') scale for the weights;
    # small non-zero biases so the bias path is actually exercised.
    std1 = float(np.sqrt(2.0 / (T * 3)))
    std2 = float(np.sqrt(2.0 / (K * 3)))
    w1 = jax.random.normal(k1, (T, T, 3), dtype=jnp.float32) * std1
    b1 = jax.random.normal(kb1, (T,), dtype=jnp.float32) * 0.1
    w2 = jax.random.normal(k2, (K, T, 3), dtype=jnp.float32) * std2
    b2 = jax.random.normal(kb2, (K,), dtype=jnp.float32) * 0.1

    # Pack weights once (off the per-call hot path).
    packed = jax.tree_util.tree_map(jax.block_until_ready,
                                    pack_ctg_params(w1, b1, w2, b2, S))

    out = jax.block_until_ready(channel_time_gate(x, packed))
    ref = jax.block_until_ready(_reference(x, w1, b1, w2, b2))

    assert out.shape == (B, 1, C, 1, K), out.shape
    np.testing.assert_allclose(np.asarray(out), np.asarray(ref), rtol=1e-4, atol=1e-4)

    print("KERNEL_OK")
</pallas_src>

<mosaic_0001>
module attributes {stable_mosaic.version = 11 : i64} {
  func.func @_ctg_kernel(%arg0: i32, %arg1: memref<128x64xf32, #tpu.memory_space<vmem>>, %arg2: memref<64x24xf32, #tpu.memory_space<vmem>>, %arg3: memref<1x8xf32, #tpu.memory_space<vmem>>, %arg4: memref<8x384xf32, #tpu.memory_space<vmem>>, %arg5: memref<1x128xf32, #tpu.memory_space<vmem>>, %arg6: memref<128x128xf32, #tpu.memory_space<vmem>>) attributes {dimension_semantics = [#tpu.dimension_semantics<parallel>], iteration_bounds = array<i64: 1>, scalar_prefetch = 0 : i64, scratch_operands = 0 : i64, tpu.core_type = #tpu.core_type<tc>, window_params = [{transform_indices = @transform_0, window_bounds = array<i64: 128, 64>}, {pipeline_mode = #tpu.pipeline_mode<synchronous>, transform_indices = @transform_1, window_bounds = array<i64: 64, 24>}, {pipeline_mode = #tpu.pipeline_mode<synchronous>, transform_indices = @transform_2, window_bounds = array<i64: 1, 8>}, {pipeline_mode = #tpu.pipeline_mode<synchronous>, transform_indices = @transform_3, window_bounds = array<i64: 8, 384>}, {pipeline_mode = #tpu.pipeline_mode<synchronous>, transform_indices = @transform_4, window_bounds = array<i64: 1, 128>}, {transform_indices = @transform_5, window_bounds = array<i64: 128, 128>}]} {
    %c0 = arith.constant 0 : index
    %c0_0 = arith.constant 0 : index
    %0 = vector.load %arg1[%c0, %c0_0] : memref<128x64xf32, #tpu.memory_space<vmem>>, vector<128x64xf32>
    %1 = tpu.iota {dimensions = array<i32: 0>} : vector<128x1xi32>
    %c16_i32 = arith.constant 16 : i32
    %c0_i32 = arith.constant 0 : i32
    %2 = arith.cmpi eq, %c16_i32, %c0_i32 : i32
    %c1_i32 = arith.constant 1 : i32
    %3 = arith.select %2, %c1_i32, %c16_i32 : i32
    %4 = vector.broadcast %3 : i32 to vector<128x1xi32>
    %5 = arith.remsi %1, %4 : vector<128x1xi32>
    %c0_i32_1 = arith.constant 0 : i32
    %6 = vector.broadcast %c0_i32_1 : i32 to vector<128x1xi32>
    %7 = arith.cmpi ne, %5, %6 : vector<128x1xi32>
    %c0_i32_2 = arith.constant 0 : i32
    %8 = vector.broadcast %c0_i32_2 : i32 to vector<128x1xi32>
    %9 = arith.cmpi slt, %5, %8 : vector<128x1xi32>
    %c0_i32_3 = arith.constant 0 : i32
    %10 = arith.cmpi slt, %3, %c0_i32_3 : i32
    %11 = vector.broadcast %10 : i1 to vector<128x1xi1>
    %12 = vector.broadcast %11 : vector<128x1xi1> to vector<128x1xi1>
    %13 = arith.xori %9, %12 : vector<128x1xi1>
    %14 = arith.andi %13, %7 : vector<128x1xi1>
    %15 = vector.broadcast %3 : i32 to vector<128x1xi32>
    %16 = arith.addi %5, %15 : vector<128x1xi32>
    %17 = arith.select %14, %16, %5 : vector<128x1xi1>, vector<128x1xi32>
    %c0_i32_4 = arith.constant 0 : i32
    %18 = vector.broadcast %c0_i32_4 : i32 to vector<128x1xi32>
    %19 = arith.cmpi ne, %17, %18 : vector<128x1xi32>
    %c15_i32 = arith.constant 15 : i32
    %20 = vector.broadcast %c15_i32 : i32 to vector<128x1xi32>
    %21 = arith.cmpi ne, %17, %20 : vector<128x1xi32>
    %c0_5 = arith.constant 0 : index
    %c0_6 = arith.constant 0 : index
    %22 = vector.load %arg2[%c0_5, %c0_6] : memref<64x24xf32, #tpu.memory_space<vmem>>, vector<64x24xf32>
    %cst = arith.constant dense<0.000000e+00> : vector<128x24xf32>
    %23 = tpu.matmul %0, %22, %cst {dimension_numbers = #tpu.dot_dimension_numbers<[1], [0], [0], [1], [0, 0, 1, 1], [], []>} : vector<128x64xf32>, vector<64x24xf32>, vector<128x24xf32> -> vector<128x24xf32>
    %c0_7 = arith.constant 0 : index
    %c0_8 = arith.constant 0 : index
    %24 = vector.load %arg3[%c0_7, %c0_8] : memref<1x8xf32, #tpu.memory_space<vmem>>, vector<1x8xf32>
    %25 = vector.extract_strided_slice %23 {offsets = [0, 0], sizes = [128, 8], strides = [1, 1]} : vector<128x24xf32> to vector<128x8xf32>
    %26 = vector.extract_strided_slice %23 {offsets = [0, 8], sizes = [128, 8], strides = [1, 1]} : vector<128x24xf32> to vector<128x8xf32>
    %27 = vector.extract_strided_slice %23 {offsets = [0, 16], sizes = [128, 8], strides = [1, 1]} : vector<128x24xf32> to vector<128x8xf32>
    %c1_i32_9 = arith.constant 1 : i32
    %28 = tpu.dynamic_rotate %25 by %c1_i32_9 dim 0 : vector<128x8xf32>, i32 -> vector<128x8xf32>
    %cst_10 = arith.constant 0.000000e+00 : f32
    %29 = vector.shape_cast %19 : vector<128x1xi1> to vector<128x1xi1>
    %30 = vector.broadcast %29 : vector<128x1xi1> to vector<128x8xi1>
    %31 = vector.broadcast %cst_10 : f32 to vector<128x8xf32>
    %32 = arith.select %30, %28, %31 : vector<128x8xi1>, vector<128x8xf32>
    %c127_i32 = arith.constant 127 : i32
    %33 = tpu.dynamic_rotate %27 by %c127_i32 dim 0 : vector<128x8xf32>, i32 -> vector<128x8xf32>
    %cst_11 = arith.constant 0.000000e+00 : f32
    %34 = vector.shape_cast %21 : vector<128x1xi1> to vector<128x1xi1>
    %35 = vector.broadcast %34 : vector<128x1xi1> to vector<128x8xi1>
    %36 = vector.broadcast %cst_11 : f32 to vector<128x8xf32>
    %37 = arith.select %35, %33, %36 : vector<128x8xi1>, vector<128x8xf32>
    %38 = arith.addf %32, %26 : vector<128x8xf32>
    %39 = arith.addf %38, %37 : vector<128x8xf32>
    %40 = vector.broadcast %24 : vector<1x8xf32> to vector<128x8xf32>
    %41 = arith.addf %39, %40 : vector<128x8xf32>
    %cst_12 = arith.constant 0.000000e+00 : f32
    %42 = vector.broadcast %cst_12 : f32 to vector<128x8xf32>
    %43 = arith.maximumf %41, %42 : vector<128x8xf32>
    %c0_13 = arith.constant 0 : index
    %c0_14 = arith.constant 0 : index
    %44 = vector.load %arg4[%c0_13, %c0_14] : memref<8x384xf32, #tpu.memory_space<vmem>>, vector<8x384xf32>
    %cst_15 = arith.constant dense<0.000000e+00> : vector<128x384xf32>
    %45 = tpu.matmul %43, %44, %cst_15 {dimension_numbers = #tpu.dot_dimension_numbers<[1], [0], [0], [1], [0, 0, 1, 1], [], []>} : vector<128x8xf32>, vector<8x384xf32>, vector<128x384xf32> -> vector<128x384xf32>
    %c0_16 = arith.constant 0 : index
    %c0_17 = arith.constant 0 : index
    %46 = vector.load %arg5[%c0_16, %c0_17] : memref<1x128xf32, #tpu.memory_space<vmem>>, vector<1x128xf32>
    %47 = vector.extract_strided_slice %45 {offsets = [0, 0], sizes = [128, 128], strides = [1, 1]} : vector<128x384xf32> to vector<128x128xf32>
    %48 = vector.extract_strided_slice %45 {offsets = [0, 128], sizes = [128, 128], strides = [1, 1]} : vector<128x384xf32> to vector<128x128xf32>
    %49 = vector.extract_strided_slice %45 {offsets = [0, 256], sizes = [128, 128], strides = [1, 1]} : vector<128x384xf32> to vector<128x128xf32>
    %c1_i32_18 = arith.constant 1 : i32
    %50 = tpu.dynamic_rotate %47 by %c1_i32_18 dim 0 : vector<128x128xf32>, i32 -> vector<128x128xf32>
    %cst_19 = arith.constant 0.000000e+00 : f32
    %51 = vector.shape_cast %19 : vector<128x1xi1> to vector<128x1xi1>
    %52 = vector.broadcast %51 : vector<128x1xi1> to vector<128x128xi1>
    %53 = vector.broadcast %cst_19 : f32 to vector<128x128xf32>
    %54 = arith.select %52, %50, %53 : vector<128x128xi1>, vector<128x128xf32>
    %c127_i32_20 = arith.constant 127 : i32
    %55 = tpu.dynamic_rotate %49 by %c127_i32_20 dim 0 : vector<128x128xf32>, i32 -> vector<128x128xf32>
    %cst_21 = arith.constant 0.000000e+00 : f32
    %56 = vector.shape_cast %21 : vector<128x1xi1> to vector<128x1xi1>
    %57 = vector.broadcast %56 : vector<128x1xi1> to vector<128x128xi1>
    %58 = vector.broadcast %cst_21 : f32 to vector<128x128xf32>
    %59 = arith.select %57, %55, %58 : vector<128x128xi1>, vector<128x128xf32>
    %60 = arith.addf %54, %48 : vector<128x128xf32>
    %61 = arith.addf %60, %59 : vector<128x128xf32>
    %62 = vector.broadcast %46 : vector<1x128xf32> to vector<128x128xf32>
    %63 = arith.addf %61, %62 : vector<128x128xf32>
    %c0_22 = arith.constant 0 : index
    %c0_23 = arith.constant 0 : index
    %64 = vector.load %arg6[%c0_22, %c0_23] : memref<128x128xf32, #tpu.memory_space<vmem>>, vector<128x128xf32>
    tpu.vector_store %arg6[%c0_22, %c0_23], %63 {strides = array<i32>} : memref<128x128xf32, #tpu.memory_space<vmem>>, vector<128x128xf32>,
    return
  }
  func.func @transform_0(%arg0: i32) -> (i32, i32) {
    %c0_i32 = arith.constant 0 : i32
    %c0_i32_0 = arith.constant 0 : i32
    return %arg0, %c0_i32 : i32, i32
  }
  func.func @transform_1(%arg0: i32) -> (i32, i32) {
    %c0_i32 = arith.constant 0 : i32
    %c0_i32_0 = arith.constant 0 : i32
    %c0_i32_1 = arith.constant 0 : i32
    return %c0_i32, %c0_i32_0 : i32, i32
  }
  func.func @transform_2(%arg0: i32) -> (i32, i32) {
    %c0_i32 = arith.constant 0 : i32
    %c0_i32_0 = arith.constant 0 : i32
    %c0_i32_1 = arith.constant 0 : i32
    return %c0_i32, %c0_i32_0 : i32, i32
  }
  func.func @transform_3(%arg0: i32) -> (i32, i32) {
    %c0_i32 = arith.constant 0 : i32
    %c0_i32_0 = arith.constant 0 : i32
    %c0_i32_1 = arith.constant 0 : i32
    return %c0_i32, %c0_i32_0 : i32, i32
  }
  func.func @transform_4(%arg0: i32) -> (i32, i32) {
    %c0_i32 = arith.constant 0 : i32
    %c0_i32_0 = arith.constant 0 : i32
    %c0_i32_1 = arith.constant 0 : i32
    return %c0_i32, %c0_i32_0 : i32, i32
  }
  func.func @transform_5(%arg0: i32) -> (i32, i32) {
    %c0_i32 = arith.constant 0 : i32
    %c0_i32_0 = arith.constant 0 : i32
    return %arg0, %c0_i32 : i32, i32
  }
}

</mosaic_0001>

<bundles_post_ra>
// kernel: tpu_custom_call.1
= control target key start
LH: loop header
LB: loop body
LE: loop exit
PB: predicated region body
PF: predicated region fallthrough
CT: control target
= control target key end

     0   :  { %s1882_s0 = inlined_call_operand.vmem [shape: f32[128,64], index: 0, kind: input, shape index: {}]   ;;  %s1883_s1 = inlined_call_operand.vmem [shape: f32[64,24], index: 1, kind: input, shape index: {}]   ;;  %s1884_s2 = inlined_call_operand.vmem [shape: f32[1,8], index: 2, kind: input, shape index: {}]   ;;  %s1885_s3 = inlined_call_operand.vmem [shape: f32[8,384], index: 3, kind: input, shape index: {}]   ;;  %s1886_s4 = inlined_call_operand.vmem [shape: f32[1,128], index: 4, kind: input, shape index: {}]   ;;  %s1887_s5 = inlined_call_operand.hbm [shape: f32[128,128], index: 5, kind: output, shape index: {}]  }
   0x1   :  { %v285_v0 = vld [vmem:[%s1883_s1 + $0x38] sm:$0xff]  ;;  %v284_v1 = vld [vmem:[%s1883_s1 + $0x30] sm:$0xff]  ;;  %v283_v2 = vld [vmem:[%s1883_s1 + $0x28] sm:$0xff] }
   0x2   :  { %343 = vmatpush.msra.mxu0 %v285_v0  ;;  %v282_v3 = vld [vmem:[%s1883_s1 + $0x20] sm:$0xff] }
   0x4   :  { %344 = vmatpush.msra.mxu0 %v284_v1 }
   0x5   :  { %10 = vsyncpa [#allocation3], 0  ;;  %v281_v4 = vld [vmem:[%s1883_s1 + $0x18] sm:$0xff]  ;;  %v280_v5 = vld [vmem:[%s1883_s1 + $0x10] sm:$0xff]  ;;  %vm286_vm0 = vcmask 523264   ;;  %v37_v25 = vlaneseq  ;;  %s1269_s15 = smov 112  }
   0x6   :  { %345 = vmatpush.msra.mxu0 %v283_v2  ;;  %v279_v6 = vld [vmem:[%s1883_s1 + $0x8] sm:$0xff]  ;;  %v278_v7 = vld [vmem:[%s1883_s1] sm:$0xff]  ;;  %v23_v10 = vld [vmem:[%s1882_s0 + $0x10] sm:$0xff]  ;;  %s1268_s1 = smov 120   ;;  %vm745_vm4 = vcmask 64512   ;;  %s1159_s26 = sshll.u32 %s1887_s5, 4  ;;  %s1160_s26 = int_to_ptr.hbm [resolvable:$true] %s1159_s26 }
   0x7   :  { %v21_v8 = vld [vmem:[%s1882_s0] sm:$0xff]  ;;  %v22_v9 = vld [vmem:[%s1882_s0 + $0x8] sm:$0xff]  ;;  %v24_v11 = vld [vmem:[%s1882_s0 + $0x18] sm:$0xff]  ;;  %v1397_v26 = vshrl.u32 %v37_v25, 7  ;;  %s1271_s27 = smov 128   ;;  %s1272_s28 = smov 8  }
   0x8   :  { %346 = vmatpush.msra.mxu0 %v282_v3  ;;  %v25_v12 = vld [vmem:[%s1882_s0 + $0x20] sm:$0xff]  ;;  %v26_v13 = vld [vmem:[%s1882_s0 + $0x28] sm:$0xff]  ;;  %v27_v14 = vld [vmem:[%s1882_s0 + $0x30] sm:$0xff] }
   0x9   :  { %v28_v15 = vld [vmem:[%s1882_s0 + $0x38] sm:$0xff]  ;;  %v29_v16 = vld [vmem:[%s1882_s0 + $0x40] sm:$0xff]  ;;  %v30_v17 = vld [vmem:[%s1882_s0 + $0x48] sm:$0xff]  ;;  %vm1888_vm1 = vcmp.lt.s32.totalorder %v1397_v26, 1  ;;  %vm562_vm3 = vcmp.lt.s32.totalorder %v1397_v26, 7 }
   0xa   :  { %347 = vmatpush.msra.mxu0 %v281_v4  ;;  %v31_v18 = vld [vmem:[%s1882_s0 + $0x50] sm:$0xff]  ;;  %v32_v19 = vld [vmem:[%s1882_s0 + $0x58] sm:$0xff]  ;;  %v33_v20 = vld [vmem:[%s1882_s0 + $0x60] sm:$0xff] }
   0xb   :  { %v34_v21 = vld [vmem:[%s1882_s0 + $0x68] sm:$0xff]  ;;  %v35_v22 = vld [vmem:[%s1882_s0 + $0x70] sm:$0xff]  ;;  %v36_v23 = vld [vmem:[%s1882_s0 + $0x78] sm:$0xff] }
   0xc   :  { %348 = vmatpush.msra.mxu0 %v280_v5  ;;  %v742_v0 = vld [vmem:[%s1885_s3] sm:$0xff]  ;;  %v743_v1 = vld [vmem:[%s1885_s3 + $0x8] sm:$0xff]  ;;  %v744_v2 = vld [vmem:[%s1885_s3 + $0x10] sm:$0xff] }
   0xd   :  { %809 = vmatpush.msra.mxu1 %v742_v0  ;;  %874 = vmatpush.msra.mxu2 %v743_v1  ;;  %v1522_v25 = vld [vmem:[%s1884_s2] ss:$0 sm:$0xff] }
   0xe   :  { %349 = vmatpush.msra.mxu0 %v279_v6  ;;  %939 = vmatpush.msra.mxu3 %v744_v2 }
  0x10   :  { %350 = vmatpush.msra.mxu0 %v278_v7 }
  0x11   :  { %1171 = vmatmul.msk.f32.vlgmr.msra.gmra.mxu0 %vm286_vm0, %v21_v8 }
  0x19   :  { %1172 = vmatmul.msk.f32.gmra.mxu0 %vm286_vm0, %v22_v9 }
  0x21   :  { %1173 = vmatmul.msk.f32.gmra.mxu0 %vm286_vm0, %v23_v10  ;;  %v58_v10 = vand.u32 15, %v1397_v26 }
  0x23   :  { %vm1498_vm2 = vcmp.ne.s32.totalorder %v58_v10, 0 }
  0x29   :  { %1174 = vmatmul.msk.f32.gmra.mxu0 %vm286_vm0, %v24_v11 }
  0x31   :  { %1175 = vmatmul.msk.f32.gmra.mxu0 %vm286_vm0, %v25_v12  ;;  %v1892_v12 = vmov 0 }
  0x32   :  { %v1893_v12 = vsel %vm1498_vm2, 4294967295, %v1892_v12 }
  0x39   :  { %1176 = vmatmul.msk.f32.gmra.mxu0 %vm286_vm0, %v26_v13 }
  0x41   :  { %1177 = vmatmul.msk.f32.gmra.mxu0 %vm286_vm0, %v27_v14 }
  0x49   :  { %1178 = vmatmul.msk.f32.gmra.mxu0 %vm286_vm0, %v28_v15 }
  0x51   :  { %1179 = vmatmul.msk.f32.gmra.mxu0 %vm286_vm0, %v29_v16 }
  0x59   :  { %1180 = vmatmul.msk.f32.gmra.mxu0 %vm286_vm0, %v30_v17  ;;  %v40_v17 = vadd.s32 16, %v1397_v26 }
  0x61   :  { %1181 = vmatmul.msk.f32.gmra.mxu0 %vm286_vm0, %v31_v18 }
  0x69   :  { %1182 = vmatmul.msk.f32.gmra.mxu0 %vm286_vm0, %v32_v19 }
  0x71   :  { %1183 = vmatmul.msk.f32.gmra.mxu0 %vm286_vm0, %v33_v20 }
  0x79   :  { %1184 = vmatmul.msk.f32.gmra.mxu0 %vm286_vm0, %v34_v21 }
  0x81   :  { %1185 = vmatmul.msk.f32.gmra.mxu0 %vm286_vm0, %v35_v22 }
  0x89   :  { %1186 = vmatmul.msk.f32.gmra.mxu0 %vm286_vm0, %v36_v23  ;;  %v39_v23 = vadd.s32 8, %v1397_v26 }
  0x8e   :  { %v1391_v24 = vpop.f32.mrf.mxu0 }
  0x8f   :  { %627 = vrot.lane.b32.xlu1 %v1391_v24, %s1268_s1  ;;  %498 = vrot.lane.b32.xlu0 %v1391_v24, %s1269_s15  ;;  %v401_v28 = vrot.slane %v1391_v24, 7 }
  0x96   :  { %v355_v27 = vpop.f32.mrf.mxu0 }
  0x97   :  { %v402_v29 = vrot.slane %v355_v27, 7  ;;  %629 = vrot.lane.b32.xlu2 %v355_v27, %s1268_s1  ;;  %500 = vrot.lane.b32.xlu0 %v355_v27, %s1269_s15 }
  0x99   :  { %v1407_v30 = vsel %vm1888_vm1, %v401_v28, %v402_v29 }
  0x9e   :  { %v358_v31 = vpop.f32.mrf.mxu0 }
  0x9f   :  { %v403_v32 = vrot.slane %v358_v31, 7  ;;  %631 = vrot.lane.b32.xlu0 %v358_v31, %s1268_s1  ;;  %502 = vrot.lane.b32.xlu1 %v358_v31, %s1269_s15  ;;  %v65_v31 = vand.u32 15, %v39_v23 }
  0xa1   :  { %v1413_v33 = vsel %vm1888_vm1, %v402_v29, %v403_v32  ;;  %v72_v29 = vand.u32 15, %v40_v17  ;;  %vm1533_vm6 = vcmp.ne.s32.totalorder %v65_v31, 15 }
  0xa3   :  { %vm1529_vm5 = vcmp.ne.s32.totalorder %v72_v29, 0 }
  0xa6   :  { %v361_v34 = vpop.f32.mrf.mxu0 }
  0xa7   :  { %v404_v35 = vrot.slane %v361_v34, 7  ;;  %504 = vrot.lane.b32.xlu2 %v361_v34, %s1269_s15 }
  0xa9   :  { %v1418_v36 = vsel %vm1888_vm1, %v403_v32, %v404_v35 }
  0xae   :  { %v364_v37 = vpop.f32.mrf.mxu0 }
  0xaf   :  { %v405_v38 = vrot.slane %v364_v37, 7  ;;  %633 = vrot.lane.b32.xlu2 %v361_v34, %s1268_s1  ;;  %506 = vrot.lane.b32.xlu1 %v364_v37, %s1269_s15 }
  0xb1   :  { %v1424_v39 = vsel %vm1888_vm1, %v404_v35, %v405_v38 }
  0xb6   :  { %v367_v40 = vpop.f32.mrf.mxu0 }
  0xb7   :  { %v406_v41 = vrot.slane %v367_v40, 7  ;;  %635 = vrot.lane.b32.xlu1 %v364_v37, %s1268_s1  ;;  %508 = vrot.lane.b32.xlu0 %v367_v40, %s1269_s15 }
  0xb9   :  { %v1430_v42 = vsel %vm1888_vm1, %v405_v38, %v406_v41 }
  0xbe   :  { %v370_v43 = vpop.f32.mrf.mxu0 }
  0xbf   :  { %v407_v44 = vrot.slane %v370_v43, 7  ;;  %637 = vrot.lane.b32.xlu0 %v367_v40, %s1268_s1  ;;  %510 = vrot.lane.b32.xlu2 %v370_v43, %s1269_s15 }
  0xc1   :  { %v1436_v45 = vsel %vm1888_vm1, %v406_v41, %v407_v44 }
  0xc6   :  { %v373_v46 = vpop.f32.mrf.mxu0 }
  0xc7   :  { %v408_v47 = vrot.slane %v373_v46, 7  ;;  %639 = vrot.lane.b32.xlu2 %v370_v43, %s1268_s1  ;;  %512 = vrot.lane.b32.xlu1 %v373_v46, %s1269_s15 }
  0xc9   :  { %v1442_v48 = vsel %vm1888_vm1, %v407_v44, %v408_v47 }
  0xce   :  { %v376_v49 = vpop.f32.mrf.mxu0 }
  0xcf   :  { %v409_v50 = vrot.slane %v376_v49, 7  ;;  %641 = vrot.lane.b32.xlu1 %v373_v46, %s1268_s1  ;;  %514 = vrot.lane.b32.xlu0 %v376_v49, %s1269_s15 }
  0xd1   :  { %v1448_v51 = vsel %vm1888_vm1, %v408_v47, %v409_v50 }
  0xd6   :  { %v379_v52 = vpop.f32.mrf.mxu0 }
  0xd7   :  { %v410_v53 = vrot.slane %v379_v52, 7  ;;  %643 = vrot.lane.b32.xlu0 %v376_v49, %s1268_s1  ;;  %516 = vrot.lane.b32.xlu2 %v379_v52, %s1269_s15  ;;  %v468_v49 = vsel %vm1529_vm5, %v1413_v33, 0.0 }
  0xd9   :  { %v1454_v54 = vsel %vm1888_vm1, %v409_v50, %v410_v53 }
  0xde   :  { %v382_v55 = vpop.f32.mrf.mxu0 }
  0xdf   :  { %v411_v56 = vrot.slane %v382_v55, 7  ;;  %645 = vrot.lane.b32.xlu2 %v379_v52, %s1268_s1  ;;  %518 = vrot.lane.b32.xlu1 %v382_v55, %s1269_s15 }
  0xe1   :  { %v1460_v57 = vsel %vm1888_vm1, %v410_v53, %v411_v56 }
  0xe6   :  { %v385_v58 = vpop.f32.mrf.mxu0 }
  0xe7   :  { %v412_v59 = vrot.slane %v385_v58, 7  ;;  %647 = vrot.lane.b32.xlu1 %v382_v55, %s1268_s1  ;;  %520 = vrot.lane.b32.xlu0 %v385_v58, %s1269_s15 }
  0xe9   :  { %v1466_v60 = vsel %vm1888_vm1, %v411_v56, %v412_v59 }
  0xee   :  { %v388_v61 = vpop.f32.mrf.mxu0 }
  0xef   :  { %v413_v62 = vrot.slane %v388_v61, 7  ;;  %649 = vrot.lane.b32.xlu0 %v385_v58, %s1268_s1  ;;  %522 = vrot.lane.b32.xlu2 %v388_v61, %s1269_s15 }
  0xf1   :  { %v1472_v63 = vsel %vm1888_vm1, %v412_v59, %v413_v62  ;;  %v630_v19 = vpop.permute.xlu2 %629  ;;  %v41_v59 = vadd.s32 24, %v1397_v26 }
  0xf2   :  { %v676_v44 = vadd.f32 %v630_v19, %v1407_v30 }
  0xf3   :  { %v79_v33 = vand.u32 15, %v41_v59 }
  0xf5   :  { %vm1557_vm7 = vcmp.ne.s32.totalorder %v79_v33, 15 }
  0xf6   :  { %v391_v3 = vpop.f32.mrf.mxu0 }
  0xf7   :  { %v414_v4 = vrot.slane %v391_v3, 7  ;;  %651 = vrot.lane.b32.xlu2 %v388_v61, %s1268_s1  ;;  %524 = vrot.lane.b32.xlu1 %v391_v3, %s1269_s15 }
  0xf9   :  { %v1487_v5 = vsel %vm1888_vm1, %v413_v62, %v414_v4  ;;  %v42_v62 = vadd.s32 32, %v1397_v26 }
  0xfe   :  { %v394_v6 = vpop.f32.mrf.mxu0 }
  0xff   :  { %v415_v7 = vrot.slane %v394_v6, 7  ;;  %653 = vrot.lane.b32.xlu1 %v391_v3, %s1268_s1  ;;  %526 = vrot.lane.b32.xlu0 %v394_v6, %s1269_s15 }
 0x101   :  { %v1491_v8 = vpop.permute.xlu0 %498  ;;  %v1495_v9 = vsel %vm1888_vm1, %v414_v4, %v415_v7  ;;  %v628_v14 = vpop.permute.xlu1 %627 }
 0x102   :  { %v546_v20 = vrot.slane %v1491_v8, 1  ;;  %v505_v37 = vpop.permute.xlu2 %504 }
 0x103   :  { %v549_v47 = vrot.slane %v505_v37, 1 }
 0x106   :  { %v397_v11 = vpop.f32.mrf.mxu0 }
 0x107   :  { %v416_v13 = vrot.slane %v397_v11, 7  ;;  %655 = vrot.lane.b32.xlu0 %v394_v6, %s1268_s1  ;;  %657 = vrot.lane.b32.xlu1 %v397_v11, %s1268_s1  ;;  %v86_v6 = vand.u32 15, %v42_v62  ;;  %v46_v62 = vadd.s32 64, %v1397_v26 }
 0x108   :  { %528 = vrot.lane.b32.xlu2 %v397_v11, %s1269_s15 }
 0x109   :  { %v433_v15 = vsel %vm1888_vm1, %v416_v13, %v401_v28  ;;  %v501_v16 = vpop.permute.xlu0 %500  ;;  %v1513_v18 = vsel %vm1888_vm1, %v415_v7, %v416_v13  ;;  %vm1569_vm8 = vcmp.ne.s32.totalorder %v86_v6, 0 }
 0x10a   :  { %v466_v21 = vsel %vm1498_vm2, %v433_v15, 0.0  ;;  %v547_v22 = vrot.slane %v501_v16, 1  ;;  %v634_v0 = vpop.permute.xlu2 %633  ;;  %v470_v17 = vsel %vm1569_vm8, %v1424_v39, 0.0 }
 0x10b   :  { %v675_v24 = vadd.f32 %v628_v14, %v466_v21  ;;  %v678_v7 = vadd.f32 %v634_v0, %v1418_v36  ;;  %v43_v36 = vadd.s32 40, %v1397_v26 }
 0x10c   :  { %v577_v27 = vsel %vm562_vm3, %v546_v20, %v547_v22 }
 0x10d   :  { %v691_v28 = vadd.f32 %v675_v24, %v577_v27 }
 0x10f   :  { %v710_v32 = vadd.f32 %v1522_v25, %v691_v28  ;;  %v93_v28 = vand.u32 15, %v43_v36 }
 0x111   :  { %v503_v34 = vpop.permute.xlu1 %502  ;;  %v726_v35 = vmax.f32 %v710_v32, 0.0  ;;  %v632_v43 = vpop.permute.xlu0 %631  ;;  %v44_v32 = vadd.s32 48, %v1397_v26  ;;  %vm1585_vm9 = vcmp.ne.s32.totalorder %v93_v28, 15 }
 0x112   :  { %v548_v41 = vrot.slane %v503_v34, 1  ;;  %v677_v52 = vadd.f32 %v632_v43, %v468_v49 }
 0x113   :  { %1187 = vmatmul.msk.f32.vlgmr.msra.gmra.mxu1 %vm745_vm4, %v726_v35  ;;  %1203 = vmatmul.msk.f32.vlgmr.msra.gmra.mxu2 %vm745_vm4, %v726_v35 }
 0x114   :  { %v576_v46 = vsel %vm562_vm3, %v547_v22, %v548_v41  ;;  %1219 = vmatmul.msk.f32.vlgmr.msra.gmra.mxu3 %vm745_vm4, %v726_v35  ;;  %v575_v55 = vsel %vm562_vm3, %v548_v41, %v549_v47 }
 0x115   :  { %v612_v50 = vsel %vm1533_vm6, %v576_v46, 0.0  ;;  %v693_v56 = vadd.f32 %v677_v52, %v575_v55 }
 0x116   :  { %v692_v53 = vadd.f32 %v676_v44, %v612_v50  ;;  %v100_v44 = vand.u32 15, %v44_v32  ;;  %v48_v32 = vadd.s32 80, %v1397_v26 }
 0x117   :  { %v712_v61 = vadd.f32 %v1522_v25, %v693_v56  ;;  %v45_v56 = vadd.s32 56, %v1397_v26 }
 0x118   :  { %v711_v30 = vadd.f32 %v1522_v25, %v692_v53  ;;  %vm1598_vm10 = vcmp.ne.s32.totalorder %v100_v44, 0 }
 0x119   :  { %v728_v4 = vmax.f32 %v712_v61, 0.0  ;;  %v511_v24 = vpop.permute.xlu2 %510  ;;  %v107_v61 = vand.u32 15, %v45_v56 }
 0x11a   :  { %v727_v58 = vmax.f32 %v711_v30, 0.0  ;;  %v552_v31 = vrot.slane %v511_v24, 1  ;;  %v47_v24 = vadd.s32 72, %v1397_v26 }
 0x11b   :  { %vm1613_vm11 = vcmp.ne.s32.totalorder %v107_v61, 15 }
 0x11c   :  { %1188 = vmatmul.msk.f32.gmra.mxu1 %vm745_vm4, %v727_v58  ;;  %1204 = vmatmul.msk.f32.gmra.mxu2 %vm745_vm4, %v727_v58 }
 0x11d   :  { %1220 = vmatmul.msk.f32.gmra.mxu3 %vm745_vm4, %v727_v58 }
 0x121   :  { %v507_v1 = vpop.permute.xlu1 %506  ;;  %v640_v52 = vpop.permute.xlu2 %639 }
 0x122   :  { %v550_v3 = vrot.slane %v507_v1, 1 }
 0x124   :  { %v574_v10 = vsel %vm562_vm3, %v549_v47, %v550_v3  ;;  %1189 = vmatmul.msk.f32.gmra.mxu1 %vm745_vm4, %v728_v4  ;;  %1205 = vmatmul.msk.f32.gmra.mxu2 %vm745_vm4, %v728_v4 }
 0x125   :  { %v614_v11 = vsel %vm1557_vm7, %v574_v10, 0.0  ;;  %1221 = vmatmul.msk.f32.gmra.mxu3 %vm745_vm4, %v728_v4 }
 0x126   :  { %v694_v14 = vadd.f32 %v678_v7, %v614_v11  ;;  %v114_v7 = vand.u32 15, %v46_v62 }
 0x128   :  { %v713_v15 = vadd.f32 %v1522_v25, %v694_v14  ;;  %vm1625_vm12 = vcmp.ne.s32.totalorder %v114_v7, 0 }
 0x129   :  { %v636_v16 = vpop.permute.xlu1 %635  ;;  %v509_v19 = vpop.permute.xlu0 %508 }
 0x12a   :  { %v679_v21 = vadd.f32 %v636_v16, %v470_v17  ;;  %v551_v22 = vrot.slane %v509_v19, 1  ;;  %v729_v23 = vmax.f32 %v713_v15, 0.0 }
 0x12c   :  { %v573_v27 = vsel %vm562_vm3, %v550_v3, %v551_v22  ;;  %1190 = vmatmul.msk.f32.gmra.mxu1 %vm745_vm4, %v729_v23  ;;  %1206 = vmatmul.msk.f32.gmra.mxu2 %vm745_vm4, %v729_v23  ;;  %v572_v35 = vsel %vm562_vm3, %v551_v22, %v552_v31 }
 0x12d   :  { %v695_v29 = vadd.f32 %v679_v21, %v573_v27  ;;  %1222 = vmatmul.msk.f32.gmra.mxu3 %vm745_vm4, %v729_v23  ;;  %v616_v46 = vsel %vm1585_vm9, %v572_v35, 0.0  ;;  %v474_v21 = vsel %vm1625_vm12, %v1448_v51, 0.0 }
 0x12f   :  { %v714_v39 = vadd.f32 %v1522_v25, %v695_v29  ;;  %v121_v29 = vand.u32 15, %v47_v24  ;;  %v51_v24 = vadd.s32 104, %v1397_v26 }
 0x131   :  { %v638_v37 = vpop.permute.xlu0 %637  ;;  %v730_v41 = vmax.f32 %v714_v39, 0.0  ;;  %v517_v15 = vpop.permute.xlu2 %516  ;;  %vm1641_vm13 = vcmp.ne.s32.totalorder %v121_v29, 15 }
 0x132   :  { %v680_v43 = vadd.f32 %v638_v37, %v1430_v42  ;;  %v472_v42 = vsel %vm1598_vm10, %v1436_v45, 0.0  ;;  %v555_v17 = vrot.slane %v517_v15, 1 }
 0x133   :  { %v681_v58 = vadd.f32 %v640_v52, %v472_v42 }
 0x134   :  { %v696_v47 = vadd.f32 %v680_v43, %v616_v46  ;;  %1191 = vmatmul.msk.f32.gmra.mxu1 %vm745_vm4, %v730_v41  ;;  %1207 = vmatmul.msk.f32.gmra.mxu2 %vm745_vm4, %v730_v41  ;;  %v128_v43 = vand.u32 15, %v48_v32  ;;  %v52_v32 = vadd.s32 112, %v1397_v26 }
 0x135   :  { %1223 = vmatmul.msk.f32.gmra.mxu3 %vm745_vm4, %v730_v41 }
 0x136   :  { %v715_v49 = vadd.f32 %v1522_v25, %v696_v47  ;;  %vm1653_vm14 = vcmp.ne.s32.totalorder %v128_v43, 0 }
 0x138   :  { %v731_v30 = vmax.f32 %v715_v49, 0.0 }
 0x139   :  { %v513_v53 = vpop.permute.xlu1 %512  ;;  %v646_v51 = vpop.permute.xlu2 %645 }
 0x13a   :  { %v553_v55 = vrot.slane %v513_v53, 1  ;;  %v684_v44 = vadd.f32 %v646_v51, %v1454_v54  ;;  %v49_v54 = vadd.s32 88, %v1397_v26 }
 0x13c   :  { %v571_v59 = vsel %vm562_vm3, %v552_v31, %v553_v55  ;;  %1192 = vmatmul.msk.f32.gmra.mxu1 %vm745_vm4, %v731_v30  ;;  %1208 = vmatmul.msk.f32.gmra.mxu2 %vm745_vm4, %v731_v30  ;;  %v135_v62 = vand.u32 15, %v49_v54  ;;  %v1920_v54 = vmov 0 }
 0x13d   :  { %v697_v33 = vadd.f32 %v681_v58, %v571_v59  ;;  %1224 = vmatmul.msk.f32.gmra.mxu3 %vm745_vm4, %v731_v30 }
 0x13e   :  { %vm1669_vm15 = vcmp.ne.s32.totalorder %v135_v62, 15 }
 0x13f   :  { %v716_v45 = vadd.f32 %v1522_v25, %v697_v33 }
 0x141   :  { %v642_v0 = vpop.permute.xlu1 %641  ;;  %v515_v1 = vpop.permute.xlu0 %514  ;;  %v732_v3 = vmax.f32 %v716_v45, 0.0 }
 0x142   :  { %v554_v6 = vrot.slane %v515_v1, 1  ;;  %v682_v10 = vadd.f32 %v642_v0, %v1442_v48  ;;  %v50_v1 = vadd.s32 96, %v1397_v26 }
 0x144   :  { %v570_v11 = vsel %vm562_vm3, %v553_v55, %v554_v6  ;;  %1193 = vmatmul.msk.f32.gmra.mxu1 %vm745_vm4, %v732_v3  ;;  %1209 = vmatmul.msk.f32.gmra.mxu2 %vm745_vm4, %v732_v3  ;;  %v569_v27 = vsel %vm562_vm3, %v554_v6, %v555_v17  ;;  %v476_v55 = vsel %vm1653_vm14, %v1460_v57, 0.0 }
 0x145   :  { %v618_v14 = vsel %vm1613_vm11, %v570_v11, 0.0  ;;  %1225 = vmatmul.msk.f32.gmra.mxu3 %vm745_vm4, %v732_v3 }
 0x146   :  { %v698_v16 = vadd.f32 %v682_v10, %v618_v14  ;;  %v142_v14 = vand.u32 15, %v50_v1 }
 0x148   :  { %v717_v48 = vadd.f32 %v1522_v25, %v698_v16  ;;  %vm1682_vm0 = vcmp.ne.s32.totalorder %v142_v14, 0 }
 0x149   :  { %v644_v19 = vpop.permute.xlu0 %643  ;;  %v523_v33 = vpop.permute.xlu2 %522 }
 0x14a   :  { %v683_v22 = vadd.f32 %v644_v19, %v474_v21  ;;  %v733_v23 = vmax.f32 %v717_v48, 0.0  ;;  %v558_v0 = vrot.slane %v523_v33, 1 }
 0x14c   :  { %v699_v28 = vadd.f32 %v683_v22, %v569_v27  ;;  %1194 = vmatmul.msk.f32.gmra.mxu1 %vm745_vm4, %v733_v23  ;;  %1210 = vmatmul.msk.f32.gmra.mxu2 %vm745_vm4, %v733_v23 }
 0x14d   :  { %1226 = vmatmul.msk.f32.gmra.mxu3 %vm745_vm4, %v733_v23 }
 0x14e   :  { %v718_v31 = vadd.f32 %v1522_v25, %v699_v28 }
 0x150   :  { %v734_v41 = vmax.f32 %v718_v31, 0.0  ;;  %v149_v31 = vand.u32 15, %v51_v24 }
 0x151   :  { %v519_v39 = vpop.permute.xlu1 %518  ;;  %v652_v19 = vpop.permute.xlu2 %651 }
 0x152   :  { %v556_v37 = vrot.slane %v519_v39, 1  ;;  %vm1697_vm1 = vcmp.ne.s32.totalorder %v149_v31, 15 }
 0x154   :  { %v568_v46 = vsel %vm562_vm3, %v555_v17, %v556_v37  ;;  %1195 = vmatmul.msk.f32.gmra.mxu1 %vm745_vm4, %v734_v41  ;;  %1211 = vmatmul.msk.f32.gmra.mxu2 %vm745_vm4, %v734_v41 }
 0x155   :  { %v620_v47 = vsel %vm1641_vm13, %v568_v46, 0.0  ;;  %1227 = vmatmul.msk.f32.gmra.mxu3 %vm745_vm4, %v734_v41 }
 0x156   :  { %v700_v52 = vadd.f32 %v684_v44, %v620_v47  ;;  %v156_v44 = vand.u32 15, %v52_v32 }
 0x158   :  { %v719_v53 = vadd.f32 %v1522_v25, %v700_v52  ;;  %vm1709_vm2 = vcmp.ne.s32.totalorder %v156_v44, 0 }
 0x159   :  { %v648_v42 = vpop.permute.xlu1 %647  ;;  %v521_v30 = vpop.permute.xlu0 %520  ;;  %v1921_v54 = vsel %vm1709_vm2, 4294967295, %v1920_v54 }
 0x15a   :  { %v685_v56 = vadd.f32 %v648_v42, %v476_v55  ;;  %v557_v58 = vrot.slane %v521_v30, 1  ;;  %v735_v59 = vmax.f32 %v719_v53, 0.0  ;;  %v53_v42 = vadd.s32 120, %v1397_v26 }
 0x15c   :  { %v567_v61 = vsel %vm562_vm3, %v556_v37, %v557_v58  ;;  %1196 = vmatmul.msk.f32.gmra.mxu1 %vm745_vm4, %v735_v59  ;;  %1212 = vmatmul.msk.f32.gmra.mxu2 %vm745_vm4, %v735_v59  ;;  %v566_v6 = vsel %vm562_vm3, %v557_v58, %v558_v0  ;;  %v480_v58 = vsel %vm1709_vm2, %v1495_v9, 0.0  ;;  %v163_v33 = vand.u32 15, %v53_v42 }
 0x15d   :  { %v701_v45 = vadd.f32 %v685_v56, %v567_v61  ;;  %1228 = vmatmul.msk.f32.gmra.mxu3 %vm745_vm4, %v735_v59  ;;  %v622_v15 = vsel %vm1669_vm15, %v566_v6, 0.0  ;;  %v1922_v9 = vmov 0 }
 0x15e   :  { %vm1727_vm2 = vcmp.ne.s32.totalorder %v163_v33, 15 }
 0x15f   :  { %v720_v57 = vadd.f32 %v1522_v25, %v701_v45  ;;  %v1923_v9 = vsel %vm1727_vm2, 4294967295, %v1922_v9 }
 0x161   :  { %v650_v7 = vpop.permute.xlu0 %649  ;;  %v736_v10 = vmax.f32 %v720_v57, 0.0 }
 0x162   :  { %v686_v11 = vadd.f32 %v650_v7, %v1466_v60  ;;  %v478_v60 = vsel %vm1682_vm0, %v1472_v63, 0.0  ;;  %v529_v53 = vpop.permute.xlu2 %528 }
 0x163   :  { %v687_v27 = vadd.f32 %v652_v19, %v478_v60  ;;  %v561_v30 = vrot.slane %v529_v53, 1 }
 0x164   :  { %v702_v16 = vadd.f32 %v686_v11, %v622_v15  ;;  %1197 = vmatmul.msk.f32.gmra.mxu1 %vm745_vm4, %v736_v10  ;;  %1213 = vmatmul.msk.f32.gmra.mxu2 %vm745_vm4, %v736_v10 }
 0x165   :  { %1229 = vmatmul.msk.f32.gmra.mxu3 %vm745_vm4, %v736_v10  ;;  %v578_v1 = vsel %vm562_vm3, %v561_v30, %v546_v20 }
 0x166   :  { %v721_v48 = vadd.f32 %v1522_v25, %v702_v16  ;;  %v626_v7 = vsel %vm1727_vm2, %v578_v1, 0.0 }
 0x168   :  { %v737_v23 = vmax.f32 %v721_v48, 0.0 }
 0x169   :  { %v525_v21 = vpop.permute.xlu1 %524 }
 0x16a   :  { %v559_v22 = vrot.slane %v525_v21, 1 }
 0x16c   :  { %v565_v28 = vsel %vm562_vm3, %v558_v0, %v559_v22  ;;  %1198 = vmatmul.msk.f32.gmra.mxu1 %vm745_vm4, %v737_v23  ;;  %1214 = vmatmul.msk.f32.gmra.mxu2 %vm745_vm4, %v737_v23 }
 0x16d   :  { %v703_v29 = vadd.f32 %v687_v27, %v565_v28  ;;  %1230 = vmatmul.msk.f32.gmra.mxu3 %vm745_vm4, %v737_v23 }
 0x16f   :  { %v722_v63 = vadd.f32 %v1522_v25, %v703_v29 }
 0x171   :  { %v654_v51 = vpop.permute.xlu1 %653  ;;  %v527_v39 = vpop.permute.xlu0 %526  ;;  %v738_v37 = vmax.f32 %v722_v63, 0.0 }
 0x172   :  { %v560_v43 = vrot.slane %v527_v39, 1  ;;  %v688_v46 = vadd.f32 %v654_v51, %v1487_v5 }
 0x174   :  { %v564_v47 = vsel %vm562_vm3, %v559_v22, %v560_v43  ;;  %1199 = vmatmul.msk.f32.gmra.mxu1 %vm745_vm4, %v738_v37  ;;  %1215 = vmatmul.msk.f32.gmra.mxu2 %vm745_vm4, %v738_v37  ;;  %v563_v62 = vsel %vm562_vm3, %v560_v43, %v561_v30 }
 0x175   :  { %v624_v52 = vsel %vm1697_vm1, %v564_v47, 0.0  ;;  %1231 = vmatmul.msk.f32.gmra.mxu3 %vm745_vm4, %v738_v37  ;;  %v1765_v37 = vld [vmem:[%s1886_s4] ss:$0 sm:$0xff]  ;;  %s1270_s4 = smov [#allocation2]  }
 0x176   :  { %v704_v5 = vadd.f32 %v688_v46, %v624_v52  ;;  %s1157_s23 = sshll.u32 %s1270_s4, 4  ;;  %s1158_s23 = int_to_ptr.vmem [resolvable:$true] %s1157_s23 }
 0x178   :  { %v723_v55 = vadd.f32 %v1522_v25, %v704_v5 }
 0x179   :  { %v656_v56 = vpop.permute.xlu0 %655  ;;  %v658_v45 = vpop.permute.xlu1 %657 }
 0x17a   :  { %v689_v59 = vadd.f32 %v656_v56, %v480_v58  ;;  %v739_v61 = vmax.f32 %v723_v55, 0.0  ;;  %v690_v57 = vadd.f32 %v658_v45, %v1513_v18 }
 0x17c   :  { %v705_v0 = vadd.f32 %v689_v59, %v563_v62  ;;  %1200 = vmatmul.msk.f32.gmra.mxu1 %vm745_vm4, %v739_v61  ;;  %1216 = vmatmul.msk.f32.gmra.mxu2 %vm745_vm4, %v739_v61  ;;  %v706_v10 = vadd.f32 %v690_v57, %v626_v7 }
 0x17d   :  { %1232 = vmatmul.msk.f32.gmra.mxu3 %vm745_vm4, %v739_v61 }
 0x17e   :  { %v724_v6 = vadd.f32 %v1522_v25, %v705_v0  ;;  %v725_v8 = vadd.f32 %v1522_v25, %v706_v10 }
 0x180   :  { %v740_v11 = vmax.f32 %v724_v6, 0.0  ;;  %v741_v20 = vmax.f32 %v725_v8, 0.0 }
 0x184   :  { %1201 = vmatmul.msk.f32.gmra.mxu1 %vm745_vm4, %v740_v11  ;;  %1217 = vmatmul.msk.f32.gmra.mxu2 %vm745_vm4, %v740_v11 }
 0x185   :  { %1233 = vmatmul.msk.f32.gmra.mxu3 %vm745_vm4, %v740_v11 }
 0x18c   :  { %1202 = vmatmul.msk.f32.gmra.mxu1 %vm745_vm4, %v741_v20  ;;  %1218 = vmatmul.msk.f32.gmra.mxu2 %vm745_vm4, %v741_v20 }
 0x18d   :  { %1234 = vmatmul.msk.f32.gmra.mxu3 %vm745_vm4, %v741_v20  ;;  %vm1924_vm4 = vcmp.lt.s32.totalorder %v1397_v26, 1 }
 0x18e   :  { %vm1925_vm2 = vmmov %vm1924_vm4 }
 0x190   :  { %v1742_v18 = vpop.f32.mrf.mxu1 }
 0x191   :  { %v990_v27 = vrot.slane %v1742_v18, 7 }
 0x196   :  { %v1744_v14 = vpop.f32.mrf.mxu2 }
 0x197   :  { %v1746_v15 = vpop.f32.mrf.mxu3 }
 0x198   :  { %v1038_v21 = vrot.slane %v1746_v15, 1 }
 0x199   :  { %v814_v16 = vpop.f32.mrf.mxu1 }
 0x19a   :  { %v991_v23 = vrot.slane %v814_v16, 7 }
 0x19c   :  { %v1020_v32 = vsel %vm1924_vm4, %v990_v27, %v991_v23  ;;  %vm1938_vm4 = vmmov %vm1925_vm2 }
 0x19f   :  { %v879_v48 = vpop.f32.mrf.mxu2 }
 0x1a0   :  { %v944_v19 = vpop.f32.mrf.mxu3  ;;  %v1087_v51 = vadd.f32 %v1020_v32, %v879_v48 }
 0x1a1   :  { %v1039_v60 = vrot.slane %v944_v19, 1  ;;  %v817_v25 = vpop.f32.mrf.mxu1 }
 0x1a2   :  { %v992_v63 = vrot.slane %v817_v25, 7 }
 0x1a3   :  { %v1753_v22 = vsel %vm562_vm3, %v1038_v21, %v1039_v60 }
 0x1a4   :  { %v1019_v46 = vsel %vm1925_vm2, %v991_v23, %v992_v63 }
 0x1a5   :  { %v1024_v42 = vsel %vm1529_vm5, %v1019_v46, 0.0  ;;  %vm1926_vm5 = vmmov %vm1925_vm2 }
 0x1a7   :  { %v882_v24 = vpop.f32.mrf.mxu2 }
 0x1a8   :  { %v947_v28 = vpop.f32.mrf.mxu3  ;;  %v1088_v30 = vadd.f32 %v1024_v42, %v882_v24 }
 0x1a9   :  { %v1040_v29 = vrot.slane %v947_v28, 1  ;;  %v820_v31 = vpop.f32.mrf.mxu1 }
 0x1aa   :  { %v993_v58 = vrot.slane %v820_v31, 7 }
 0x1ab   :  { %v1067_v39 = vsel %vm562_vm3, %v1039_v60, %v1040_v29 }
 0x1ac   :  { %v1071_v43 = vsel %vm1533_vm6, %v1067_v39, 0.0  ;;  %v1018_v38 = vsel %vm1925_vm2, %v992_v63, %v993_v58  ;;  %vm1927_vm6 = vmmov %vm1925_vm2 }
 0x1ad   :  { %v1103_v44 = vadd.f32 %v1087_v51, %v1071_v43 }
 0x1af   :  { %v1122_v47 = vadd.f32 %v1765_v37, %v1103_v44  ;;  %v885_v52 = vpop.f32.mrf.mxu2 }
 0x1b0   :  { %v950_v53 = vpop.f32.mrf.mxu3  ;;  %v1089_v1 = vadd.f32 %v1018_v38, %v885_v52 }
 0x1b1   :  { %1138 = vst [vmem:[#allocation2 + $0x8] sm:$0xff] %v1122_v47  ;;  %v1041_v5 = vrot.slane %v950_v53, 1  ;;  %v823_v55 = vpop.f32.mrf.mxu1 }
 0x1b2   :  { %v994_v0 = vrot.slane %v823_v55, 7 }
 0x1b3   :  { %v1066_v56 = vsel %vm562_vm3, %v1040_v29, %v1041_v5 }
 0x1b4   :  { %v1104_v40 = vadd.f32 %v1088_v30, %v1066_v56  ;;  %v1017_v10 = vsel %vm1926_vm5, %v993_v58, %v994_v0  ;;  %vm1940_vm5 = vnez %v1923_v9 }
 0x1b5   :  { %v1026_v16 = vsel %vm1569_vm8, %v1017_v10, 0.0  ;;  %vm1929_vm8 = vmmov %vm1925_vm2 }
 0x1b6   :  { %v1123_v59 = vadd.f32 %v1765_v37, %v1104_v40 }
 0x1b7   :  { %v888_v33 = vpop.f32.mrf.mxu2 }
 0x1b8   :  { %1139 = vst [vmem:[#allocation2 + $0x10] sm:$0xff] %v1123_v59  ;;  %v953_v61 = vpop.f32.mrf.mxu3  ;;  %v1090_v60 = vadd.f32 %v1026_v16, %v888_v33 }
 0x1b9   :  { %v1042_v62 = vrot.slane %v953_v61, 1  ;;  %v826_v45 = vpop.f32.mrf.mxu1 }
 0x1ba   :  { %v995_v23 = vrot.slane %v826_v45, 7 }
 0x1bb   :  { %v1065_v57 = vsel %vm562_vm3, %v1041_v5, %v1042_v62 }
 0x1bc   :  { %v1073_v6 = vsel %vm1557_vm7, %v1065_v57, 0.0  ;;  %v1016_v13 = vsel %vm1927_vm6, %v994_v0, %v995_v23  ;;  %vm1928_vm7 = vmmov %vm1925_vm2 }
 0x1bd   :  { %v1105_v7 = vadd.f32 %v1089_v1, %v1073_v6 }
 0x1bf   :  { %v1124_v11 = vadd.f32 %v1765_v37, %v1105_v7  ;;  %v891_v8 = vpop.f32.mrf.mxu2 }
 0x1c0   :  { %v956_v20 = vpop.f32.mrf.mxu3  ;;  %v1091_v51 = vadd.f32 %v1016_v13, %v891_v8 }
 0x1c1   :  { %1140 = vst [vmem:[#allocation2 + $0x18] sm:$0xff] %v1124_v11  ;;  %v1043_v48 = vrot.slane %v956_v20, 1  ;;  %v829_v19 = vpop.f32.mrf.mxu1 }
 0x1c2   :  { %v996_v63 = vrot.slane %v829_v19, 7 }
 0x1c3   :  { %v1064_v25 = vsel %vm562_vm3, %v1042_v62, %v1043_v48 }
 0x1c4   :  { %v1106_v2 = vadd.f32 %v1090_v60, %v1064_v25  ;;  %v1015_v46 = vsel %vm1928_vm7, %v995_v23, %v996_v63 }
 0x1c5   :  { %v1028_v42 = vsel %vm1598_vm10, %v1015_v46, 0.0  ;;  %vm1931_vm10 = vmmov %vm1925_vm2 }
 0x1c6   :  { %v1125_v24 = vadd.f32 %v1765_v37, %v1106_v2 }
 0x1c7   :  { %v894_v28 = vpop.f32.mrf.mxu2 }
 0x1c8   :  { %1141 = vst [vmem:[#allocation2 + $0x20] sm:$0xff] %v1125_v24  ;;  %v959_v29 = vpop.f32.mrf.mxu3  ;;  %v1092_v30 = vadd.f32 %v1028_v42, %v894_v28 }
 0x1c9   :  { %v1044_v31 = vrot.slane %v959_v29, 1  ;;  %v832_v32 = vpop.f32.mrf.mxu1 }
 0x1ca   :  { %v997_v40 = vrot.slane %v832_v32, 7 }
 0x1cb   :  { %v1063_v39 = vsel %vm562_vm3, %v1043_v48, %v1044_v31 }
 0x1cc   :  { %v1075_v43 = vsel %vm1585_vm9, %v1063_v39, 0.0  ;;  %v1014_v50 = vsel %vm1929_vm8, %v996_v63, %v997_v40  ;;  %vm1930_vm9 = vmmov %vm1925_vm2 }
 0x1cd   :  { %v1107_v44 = vadd.f32 %v1091_v51, %v1075_v43 }
 0x1cf   :  { %v1126_v47 = vadd.f32 %v1765_v37, %v1107_v44  ;;  %v897_v52 = vpop.f32.mrf.mxu2 }
 0x1d0   :  { %v962_v53 = vpop.f32.mrf.mxu3  ;;  %v1093_v38 = vadd.f32 %v1014_v50, %v897_v52 }
 0x1d1   :  { %1142 = vst [vmem:[#allocation2 + $0x28] sm:$0xff] %v1126_v47  ;;  %v1045_v5 = vrot.slane %v962_v53, 1  ;;  %v835_v55 = vpop.f32.mrf.mxu1 }
 0x1d2   :  { %v998_v45 = vrot.slane %v835_v55, 7 }
 0x1d3   :  { %v1062_v56 = vsel %vm562_vm3, %v1044_v31, %v1045_v5 }
 0x1d4   :  { %v1108_v34 = vadd.f32 %v1092_v30, %v1062_v56  ;;  %v1013_v6 = vsel %vm1930_vm9, %v997_v40, %v998_v45 }
 0x1d5   :  { %v1030_v8 = vsel %vm1625_vm12, %v1013_v6, 0.0  ;;  %vm1933_vm12 = vmmov %vm1925_vm2 }
 0x1d6   :  { %v1127_v58 = vadd.f32 %v1765_v37, %v1108_v34 }
 0x1d7   :  { %v900_v59 = vpop.f32.mrf.mxu2 }
 0x1d8   :  { %1143 = vst [vmem:[#allocation2 + $0x30] sm:$0xff] %v1127_v58  ;;  %v965_v33 = vpop.f32.mrf.mxu3  ;;  %v1094_v48 = vadd.f32 %v1030_v8, %v900_v59 }
 0x1d9   :  { %v1046_v61 = vrot.slane %v965_v33, 1  ;;  %v838_v62 = vpop.f32.mrf.mxu1 }
 0x1da   :  { %v999_v60 = vrot.slane %v838_v62, 7 }
 0x1db   :  { %v1061_v0 = vsel %vm562_vm3, %v1045_v5, %v1046_v61 }
 0x1dc   :  { %v1077_v1 = vsel %vm1613_vm11, %v1061_v0, 0.0  ;;  %v1012_v36 = vsel %vm1931_vm10, %v998_v45, %v999_v60  ;;  %vm1932_vm11 = vmmov %vm1925_vm2 }
 0x1dd   :  { %v1109_v57 = vadd.f32 %v1093_v38, %v1077_v1 }
 0x1df   :  { %v1128_v7 = vadd.f32 %v1765_v37, %v1109_v57  ;;  %v903_v10 = vpop.f32.mrf.mxu2 }
 0x1e0   :  { %v968_v11 = vpop.f32.mrf.mxu3  ;;  %v1095_v31 = vadd.f32 %v1012_v36, %v903_v10 }
 0x1e1   :  { %1144 = vst [vmem:[#allocation2 + $0x38] sm:$0xff] %v1128_v7  ;;  %v1047_v20 = vrot.slane %v968_v11, 1  ;;  %v841_v16 = vpop.f32.mrf.mxu1 }
 0x1e2   :  { %v1000_v29 = vrot.slane %v841_v16, 7 }
 0x1e3   :  { %v1060_v19 = vsel %vm562_vm3, %v1046_v61, %v1047_v20 }
 0x1e4   :  { %v1110_v4 = vadd.f32 %v1094_v48, %v1060_v19  ;;  %v1011_v51 = vsel %vm1932_vm11, %v999_v60, %v1000_v29 }
 0x1e5   :  { %v1032_v46 = vsel %vm1653_vm14, %v1011_v51, 0.0  ;;  %vm1935_vm14 = vmmov %vm1925_vm2 }
 0x1e6   :  { %v1129_v25 = vadd.f32 %v1765_v37, %v1110_v4 }
 0x1e7   :  { %v906_v2 = vpop.f32.mrf.mxu2 }
 0x1e8   :  { %1145 = vst [vmem:[#allocation2 + $0x40] sm:$0xff] %v1129_v25  ;;  %v971_v23 = vpop.f32.mrf.mxu3  ;;  %v1096_v53 = vadd.f32 %v1032_v46, %v906_v2 }
 0x1e9   :  { %v1048_v24 = vrot.slane %v971_v23, 1  ;;  %v844_v28 = vpop.f32.mrf.mxu1 }
 0x1ea   :  { %v1001_v5 = vrot.slane %v844_v28, 7 }
 0x1eb   :  { %v1059_v32 = vsel %vm562_vm3, %v1047_v20, %v1048_v24 }
 0x1ec   :  { %v1079_v13 = vsel %vm1641_vm13, %v1059_v32, 0.0  ;;  %v1010_v49 = vsel %vm1933_vm12, %v1000_v29, %v1001_v5  ;;  %vm1934_vm13 = vmmov %vm1925_vm2 }
 0x1ed   :  { %v1111_v63 = vadd.f32 %v1095_v31, %v1079_v13 }
 0x1ef   :  { %v1130_v39 = vadd.f32 %v1765_v37, %v1111_v63  ;;  %v909_v43 = vpop.f32.mrf.mxu2 }
 0x1f0   :  { %v974_v44 = vpop.f32.mrf.mxu3  ;;  %v1097_v59 = vadd.f32 %v1010_v49, %v909_v43 }
 0x1f1   :  { %1146 = vst [vmem:[#allocation2 + $0x48] sm:$0xff] %v1130_v39  ;;  %v1049_v47 = vrot.slane %v974_v44, 1  ;;  %v847_v52 = vpop.f32.mrf.mxu1 }
 0x1f2   :  { %v1002_v58 = vrot.slane %v847_v52, 7 }
 0x1f3   :  { %v1058_v42 = vsel %vm562_vm3, %v1048_v24, %v1049_v47 }
 0x1f4   :  { %v1112_v35 = vadd.f32 %v1096_v53, %v1058_v42  ;;  %v1009_v50 = vsel %vm1934_vm13, %v1001_v5, %v1002_v58 }
 0x1f5   :  { %v1034_v1 = vsel %vm1682_vm0, %v1009_v50, 0.0  ;;  %vm1937_vm0 = vnez %v1893_v12 }
 0x1f6   :  { %v1131_v55 = vadd.f32 %v1765_v37, %v1112_v35 }
 0x1f7   :  { %v912_v30 = vpop.f32.mrf.mxu2 }
 0x1f8   :  { %1147 = vst [vmem:[#allocation2 + $0x50] sm:$0xff] %v1131_v55  ;;  %v977_v56 = vpop.f32.mrf.mxu3  ;;  %v1098_v7 = vadd.f32 %v1034_v1, %v912_v30 }
 0x1f9   :  { %v1050_v34 = vrot.slane %v977_v56, 1  ;;  %v850_v40 = vpop.f32.mrf.mxu1 }
 0x1fa   :  { %v1003_v11 = vrot.slane %v850_v40, 7 }
 0x1fb   :  { %v1057_v33 = vsel %vm562_vm3, %v1049_v47, %v1050_v34 }
 0x1fc   :  { %v1081_v61 = vsel %vm1669_vm15, %v1057_v33, 0.0  ;;  %v1008_v17 = vsel %vm1935_vm14, %v1002_v58, %v1003_v11  ;;  %vm1936_vm15 = vmmov %vm1925_vm2 }
 0x1fd   :  { %v1113_v62 = vadd.f32 %v1097_v59, %v1081_v61 }
 0x1ff   :  { %v1132_v45 = vadd.f32 %v1765_v37, %v1113_v62  ;;  %v915_v38 = vpop.f32.mrf.mxu2 }
 0x200   :  { %v980_v0 = vpop.f32.mrf.mxu3  ;;  %v1099_v25 = vadd.f32 %v1008_v17, %v915_v38 }
 0x201   :  { %1148 = vst [vmem:[#allocation2 + $0x58] sm:$0xff] %v1132_v45  ;;  %v1051_v57 = vrot.slane %v980_v0, 1  ;;  %v853_v6 = vpop.f32.mrf.mxu1 }
 0x202   :  { %v1004_v4 = vrot.slane %v853_v6, 7 }
 0x203   :  { %v1056_v10 = vsel %vm562_vm3, %v1050_v34, %v1051_v57 }
 0x204   :  { %v1114_v3 = vadd.f32 %v1098_v7, %v1056_v10  ;;  %v1007_v29 = vsel %vm1938_vm4, %v1003_v11, %v1004_v4 }
 0x206   :  { %v1133_v8 = vadd.f32 %v1765_v37, %v1114_v3 }
 0x207   :  { %v918_v20 = vpop.f32.mrf.mxu2 }
 0x208   :  { %1149 = vst [vmem:[#allocation2 + $0x60] sm:$0xff] %v1133_v8  ;;  %v983_v16 = vpop.f32.mrf.mxu3 }
 0x209   :  { %v1052_v48 = vrot.slane %v983_v16, 1  ;;  %v856_v19 = vpop.f32.mrf.mxu1 }
 0x20a   :  { %v1005_v60 = vrot.slane %v856_v19, 7 }
 0x20b   :  { %v1055_v2 = vsel %vm562_vm3, %v1051_v57, %v1052_v48 }
 0x20c   :  { %v1083_v23 = vsel %vm1697_vm1, %v1055_v2, 0.0  ;;  %v1021_v24 = vsel %vm1936_vm15, %v1005_v60, %v990_v27  ;;  %vm1939_vm1 = vnez %v1921_v54  ;;  %v1006_v39 = vsel %vm1925_vm2, %v1004_v4, %v1005_v60 }
 0x20d   :  { %v1115_v28 = vadd.f32 %v1099_v25, %v1083_v23  ;;  %v1022_v36 = vsel %vm1937_vm0, %v1021_v24, 0.0  ;;  %v1036_v18 = vsel %vm1939_vm1, %v1007_v29, 0.0 }
 0x20e   :  { %v1086_v31 = vadd.f32 %v1022_v36, %v1744_v14  ;;  %v1100_v51 = vadd.f32 %v1036_v18, %v918_v20 }
 0x20f   :  { %v1134_v32 = vadd.f32 %v1765_v37, %v1115_v28  ;;  %v921_v41 = vpop.f32.mrf.mxu2 }
 0x210   :  { %v1102_v13 = vadd.f32 %v1086_v31, %v1753_v22  ;;  %v986_v63 = vpop.f32.mrf.mxu3  ;;  %v1101_v43 = vadd.f32 %v1006_v39, %v921_v41 }
 0x211   :  { %1150 = vst [vmem:[#allocation2 + $0x68] sm:$0xff] %v1134_v32  ;;  %v1053_v27 = vrot.slane %v986_v63, 1 }
 0x212   :  { %v1121_v12 = vadd.f32 %v1765_v37, %v1102_v13 }
 0x213   :  { %v1054_v14 = vsel %vm562_vm3, %v1052_v48, %v1053_v27  ;;  %v1069_v22 = vsel %vm562_vm3, %v1053_v27, %v1038_v21 }
 0x214   :  { %1137 = vst [vmem:[#allocation2] sm:$0xff] %v1121_v12  ;;  %v1085_v54 = vsel %vm1940_vm5, %v1069_v22, 0.0  ;;  %v1116_v44 = vadd.f32 %v1100_v51, %v1054_v14 }
 0x215   :  { %v1117_v46 = vadd.f32 %v1101_v43, %v1085_v54 }
 0x216   :  { %v1135_v47 = vadd.f32 %v1765_v37, %v1116_v44 }
 0x217   :  { %v1136_v15 = vadd.f32 %v1765_v37, %v1117_v46 }
 0x218   :  { %1151 = vst [vmem:[#allocation2 + $0x70] sm:$0xff] %v1135_v47 }
 0x219   :  { %1152 = vst [vmem:[#allocation2 + $0x78] sm:$0xff] %v1136_v15 }
 0x21a   :  { %1165 = dma.vmem_to_hbm [thread:$0]  %s1158_s23, 2048, %s1160_s26, [#allocation3], %s1271_s27, %s1271_s27, %s1272_s28  }
 0x21b   :  { %1266 = dma.done.wait [#allocation3], 2048  }
 0x21c   :  { %1267 = vsyncadd [#allocation3], 4294965248 }
 0x21d   :  { %1170 = vsyncpa [#allocation3], 1 }

</bundles_post_ra>
